<compile_context>
chip_gen: v6e
topology: v6e:2x2x1
jax: 0.10.0
libtpu: 0.0.40
codegen_flags: <defaults>
</compile_context>

<pallas_src>
import functools

import jax
import jax.numpy as jnp
from jax.experimental import pallas as pl
from jax.experimental.pallas import tpu as pltpu


# ----------------------------------------------------------------------------
# Fused TCN kernel: all TemporalBlocks; emits lane-dense features.
# ----------------------------------------------------------------------------
def _tcn_fused_kernel(x_ref, wp_ref, o_ref, *, layer_meta, ksize, seq_len,
                      mxu_dtype):
    h = x_ref[...]                                # (C0, nl) f32; lane = n*L + t
    nl = h.shape[1]
    w_all = wp_ref[...]                           # (rows, W) packed weights

    # Local time index of every lane (in-kernel causal mask; no HBM input).
    lane = jax.lax.broadcasted_iota(jnp.int32, (1, nl), 1)
    if seq_len & (seq_len - 1) == 0:              # power-of-two L -> AND
        t_local = lane & (seq_len - 1)
    else:
        t_local = lane % seq_len

    def causal_shift(v, s):
        # Right-shift every length-seq_len lane segment (one sample) by s,
        # zero-filling.  jnp.roll wraps across segment / block boundaries;
        # the t_local mask zeroes exactly those lanes (also handles s >= L).
        if s == 0:
            return v
        rolled = jnp.roll(v, s, axis=1)
        return jnp.where(t_local >= s, rolled, 0.0)

    def causal_conv(v, c_in, c_out, dil, row):
        # K accumulating matmuls (no sublane-concat im2col).  Weight column
        # block j pairs with causal shift j*dil (torch tap index K-1-j).
        bias = w_all[row:row + c_out, ksize * c_in:ksize * c_in + 1]
        acc = None
        for j in range(ksize):
            wj = w_all[row:row + c_out, j * c_in:(j + 1) * c_in]
            vj = causal_shift(v, j * dil)
            part = jnp.dot(wj.astype(mxu_dtype), vj.astype(mxu_dtype),
                           preferred_element_type=jnp.float32)
            acc = part if acc is None else acc + part
        return acc + bias

    for c_in, c_out, dil, r1, r2, rd in layer_meta:
        h1 = jnp.maximum(causal_conv(h, c_in, c_out, dil, r1), 0.0)
        h2 = jnp.maximum(causal_conv(h1, c_out, c_out, dil, r2), 0.0)
        if rd >= 0:                               # 1x1 downsample conv
            wd = w_all[rd:rd + c_out, 0:c_in]
            bd = w_all[rd:rd + c_out, c_in:c_in + 1]
            res = jnp.dot(wd.astype(mxu_dtype), h.astype(mxu_dtype),
                          preferred_element_type=jnp.float32) + bd
        else:
            res = h
        h = h2 + res                              # spec: `out + res`, no ReLU

    o_ref[...] = h.astype(o_ref.dtype)            # (c_last, nl), lane-dense


# ----------------------------------------------------------------------------
# Wrapper helpers
# ----------------------------------------------------------------------------
def _pack_block_weights(blocks, ksize):
    """Pack every conv weight+bias into one lane-dense (rows, W) f32 buffer.
    Returns (packed, layer_meta) with static row offsets for in-kernel use."""
    max_cols = 1
    for b in blocks:
        max_cols = max(max_cols, b["w1"].shape[1] + 1, b["w2"].shape[1] + 1)
        if "wd" in b:
            max_cols = max(max_cols, b["wd"].shape[1] + 1)
    W = pl.cdiv(max_cols, 128) * 128

    rows, meta, r = [], [], 0

    def add(w, bias):
        nonlocal r
        c_out, cols = w.shape
        slab = jnp.zeros((c_out, W), jnp.float32)
        slab = slab.at[:, :cols].set(w)
        slab = slab.at[:, cols:cols + 1].set(bias.reshape(c_out, 1))
        rows.append(slab)
        off, r = r, r + c_out
        return off

    for b in blocks:
        c_out, kc_in = b["w1"].shape
        c_in = kc_in // ksize
        r1 = add(b["w1"], b["b1"])
        r2 = add(b["w2"], b["b2"])
        rd = add(b["wd"], b["bd"]) if "wd" in b else -1
        meta.append((c_in, c_out, int(b["dilation"]), r1, r2, rd))

    packed = jnp.concatenate(rows, axis=0)
    pad = (-packed.shape[0]) % 8                  # sublane-tidy packing
    if pad:
        packed = jnp.pad(packed, ((0, pad), (0, 0)))
    return packed, tuple(meta)


def _vmem_estimate_bytes(nl, channels, packed_bytes):
    """Rough per-grid-step VMEM footprint for a lane block of width nl."""
    c0, c_last = channels[0], channels[-1]
    ins = [channels[0]] + list(channels[:-1])
    live = max(ci + 3 * co for ci, co in zip(ins, channels))  # h, shift, h1, h2
    act = 4 * nl * live * 2                       # 2x slack for temporaries
    io = 4 * nl * (c0 + c_last) * 2               # double-buffered x / feats
    return int(act + io + 2 * packed_bytes)


def _pick_batch_block(n, l, channels, packed_bytes, budget_bytes):
    """LARGEST batch block bn (divisor of n) whose lane width bn*l is a
    multiple of 128 and whose estimated VMEM footprint fits the budget."""
    divs = [bn for bn in range(1, n + 1) if n % bn == 0]
    aligned = [bn for bn in divs if (bn * l) % 128 == 0]
    fitting = [bn for bn in aligned
               if _vmem_estimate_bytes(bn * l, channels, packed_bytes)
               <= budget_bytes]
    if fitting:
        return max(fitting)
    if aligned:
        return min(aligned)
    return n      # whole batch: block == full array dims is always legal


# ----------------------------------------------------------------------------
# Public forward
# ----------------------------------------------------------------------------
def temporal_conv_net(x, params, *, ksize=2, features_only=False,
                      batch_block=None, mxu_dtype=jnp.float32):
    """Fused TCN forward.  x: (N, C0, L) f32 -> (N, out_len) f32 or features."""
    N, C0, L = x.shape
    blocks = params["blocks"]
    c_last = blocks[-1]["w1"].shape[0]
    channels = tuple(b["w1"].shape[0] for b in blocks)

    wp, layer_meta = _pack_block_weights(blocks, ksize)
    wp_bytes = int(wp.size) * 4

    # Per-generation VMEM budget (v7x: 64 MiB/TC physical; v5e/v6e: 128 MiB
    # physical but only 16/32 MiB scoped by default -> raised explicitly).
    try:
        vmem_cap = int(pltpu.get_tpu_info().vmem_capacity_bytes)
    except Exception:  # pragma: no cover - conservative fallback
        vmem_cap = 64 << 20
    budget = vmem_cap // 3

    bn = (_pick_batch_block(N, L, channels, wp_bytes, budget)
          if batch_block is None else batch_block)
    assert N % bn == 0, "batch must be divisible by the batch block"
    nb = N // bn
    nl = bn * L
    # TODO(synk): on v7x prefer nb a multiple of 2 (ideally >=4) once N*L is
    #             large enough, so both TensorCores get pipelined grid steps.

    est = _vmem_estimate_bytes(nl, channels, wp_bytes)
    vmem_limit = int(min(vmem_cap * 3 // 4, max(32 << 20, 2 * est)))

    # Batch folded into lanes: (N, C, L) -> (C, N*L); lane p = sample*L + t.
    x_k = jnp.transpose(x, (1, 0, 2)).reshape(C0, N * L)

    kernel = functools.partial(_tcn_fused_kernel, layer_meta=layer_meta,
                               ksize=ksize, seq_len=L, mxu_dtype=mxu_dtype)

    feats = pl.pallas_call(
        kernel,
        out_shape=jax.ShapeDtypeStruct((c_last, N * L), jnp.float32),
        grid_spec=pltpu.PrefetchScalarGridSpec(
            num_scalar_prefetch=0,
            grid=(nb,),
            in_specs=[pl.BlockSpec((C0, nl), lambda i: (0, i)),
                      pl.BlockSpec(wp.shape, lambda i: (0, 0))],
            out_specs=pl.BlockSpec((c_last, nl), lambda i: (0, i)),
        ),
        compiler_params=pltpu.CompilerParams(
            dimension_semantics=("parallel",),
            vmem_limit_bytes=vmem_limit),
    )(x_k, wp)

    feats = jnp.transpose(feats.reshape(c_last, N, L), (1, 0, 2))  # (N, C, L)
    if features_only:
        return feats

    # Tiny (N,L)@(L,out_len) Linear + exact Sigmoid head runs in XLA (hoisted
    # out of the kernel per perf review: avoids per-sample lane slicing and
    # sub-128-lane masked stores for a negligible matmul).
    assert c_last == 1, "head (x.squeeze(1)) needs the last level = 1 channel"
    y = jnp.dot(feats[:, 0, :], params["w_lin_t"],
                precision="highest") + params["b_lin"]
    return jax.nn.sigmoid(y)


# ----------------------------------------------------------------------------
# Deterministic parameter initialization (synthetic; mirrors module shapes)
# ----------------------------------------------------------------------------
def init_params(key, num_channels, ksize, in_len, out_len):
    def weight_norm_conv(k_v, k_g, shape):
        # PyTorch weight_norm(dim=0): w = g * v / ||v|| (norm over dims 1,2)
        v = 0.01 * jax.random.normal(k_v, shape, jnp.float32)
        g = jnp.abs(jax.random.normal(k_g, (shape[0], 1, 1), jnp.float32)) + 0.5
        norm = jnp.sqrt(jnp.sum(v * v, axis=(1, 2), keepdims=True)) + 1e-12
        return g * v / norm                       # (C_out, C_in, K)

    def conv_to_tap_matrix(w):
        # Column block j (paired with causal shift j*dilation) is torch tap
        # index K-1-j:   out[t] = sum_j w[:, :, K-1-j] @ x[t - j*dilation].
        K = w.shape[2]
        return jnp.concatenate([w[:, :, K - 1 - j] for j in range(K)], axis=1)

    blocks = []
    for i, c_out in enumerate(num_channels):
        c_in = num_channels[0] if i == 0 else num_channels[i - 1]
        key, k0, k1, k2, k3, k4, k5, k6, k7 = jax.random.split(key, 9)
        w1 = weight_norm_conv(k0, k1, (c_out, c_in, ksize))
        b1 = 0.1 * jax.random.normal(k2, (c_out,), jnp.float32)
        w2 = weight_norm_conv(k3, k4, (c_out, c_out, ksize))
        b2 = 0.1 * jax.random.normal(k5, (c_out,), jnp.float32)
        blk = {
            "dilation": 2 ** i,
            "w1": conv_to_tap_matrix(w1),         # (C_out, K*C_in)
            "b1": b1.reshape(c_out, 1),
            "w2": conv_to_tap_matrix(w2),         # (C_out, K*C_out)
            "b2": b2.reshape(c_out, 1),
        }
        if c_in != c_out:                         # 1x1 downsample conv
            wd = 0.01 * jax.random.normal(k6, (c_out, c_in), jnp.float32)
            bd = 0.1 * jax.random.normal(k7, (c_out,), jnp.float32)
            blk["wd"] = wd
            blk["bd"] = bd.reshape(c_out, 1)
        blocks.append(blk)

    key, kl, kb = jax.random.split(key, 3)
    w_lin = 0.1 * jax.random.normal(kl, (out_len, in_len), jnp.float32)
    b_lin = 0.1 * jax.random.normal(kb, (out_len,), jnp.float32)
    return {"blocks": blocks,
            "w_lin_t": jnp.transpose(w_lin),      # (L, out_len)
            "b_lin": b_lin.reshape(1, out_len)}


# ----------------------------------------------------------------------------
# Pure-JAX reference of the same forward math (numerics sanity check)
# ----------------------------------------------------------------------------
def _reference_forward(x, params, *, ksize):
    h = x                                         # (N, C, L)
    L = x.shape[2]
    for blk in params["blocks"]:
        d = blk["dilation"]

        def conv(hin, w_mat, bias):
            c_in = hin.shape[1]
            out = jnp.zeros((hin.shape[0], w_mat.shape[0], L), jnp.float32)
            for j in range(ksize):
                wj = w_mat[:, j * c_in:(j + 1) * c_in]
                s = j * d
                shifted = jnp.pad(hin, ((0, 0), (0, 0), (s, 0)))[:, :, :L]
                out = out + jnp.einsum("oc,ncl->nol", wj, shifted,
                                       precision="highest")
            return out + bias.reshape(1, -1, 1)

        h1 = jax.nn.relu(conv(h, blk["w1"], blk["b1"]))
        h2 = jax.nn.relu(conv(h1, blk["w2"], blk["b2"]))
        if "wd" in blk:
            res = jnp.einsum("oc,ncl->nol", blk["wd"], h,
                             precision="highest") + blk["bd"].reshape(1, -1, 1)
        else:
            res = h
        h = h2 + res
    feat = h[:, 0, :]                             # x.squeeze(1)
    y = jnp.dot(feat, params["w_lin_t"], precision="highest") + params["b_lin"]
    return jax.nn.sigmoid(y)


# ----------------------------------------------------------------------------
if __name__ == "__main__":
    # Config consistent with the module: num_channels = [4, 8, 1] (last level
    # has 1 channel so x.squeeze(1) works), kernel_size = 2,
    # args.input_length = 16, args.out_length = 8, batch = 16.
    num_channels = [4, 8, 1]
    kernel_size = 2
    input_length = 16
    out_length = 8
    batch = 16

    key = jax.random.PRNGKey(0)
    key, kx = jax.random.split(key)
    x = jax.random.normal(kx, (batch, num_channels[0], input_length),
                          jnp.float32)
    params = init_params(key, num_channels, kernel_size, input_length,
                         out_length)

    out = temporal_conv_net(x, params, ksize=kernel_size, features_only=False)
    out = jax.block_until_ready(out)
    assert out.shape == (batch, out_length)
    assert bool(jnp.all(jnp.isfinite(out)))

    feats = temporal_conv_net(x, params, ksize=kernel_size, features_only=True)
    feats = jax.block_until_ready(feats)
    assert feats.shape == (batch, num_channels[-1], input_length)

    # Numerics check against the plain-JAX reference (tolerance covers MXU
    # f32 multi-pass precision differences).
    ref = _reference_forward(x, params, ksize=kernel_size)
    max_err = float(jnp.max(jnp.abs(out - ref)))
    assert jnp.allclose(out, ref, atol=1e-2, rtol=1e-2), max_err

    print("KERNEL_OK")
</pallas_src>

<mosaic_0001>
module attributes {stable_mosaic.version = 11 : i64} {
  func.func @_tcn_fused_kernel(%arg0: i32, %arg1: memref<4x256xf32, #tpu.memory_space<vmem>>, %arg2: memref<40x128xf32, #tpu.memory_space<vmem>>, %arg3: memref<1x256xf32, #tpu.memory_space<vmem>>) attributes {dimension_semantics = [#tpu.dimension_semantics<parallel>], iteration_bounds = array<i64: 1>, scalar_prefetch = 0 : i64, scratch_operands = 0 : i64, tpu.core_type = #tpu.core_type<tc>, window_params = [{transform_indices = @transform_0, window_bounds = array<i64: 4, 256>}, {pipeline_mode = #tpu.pipeline_mode<synchronous>, transform_indices = @transform_1, window_bounds = array<i64: 40, 128>}, {transform_indices = @transform_2, window_bounds = array<i64: 1, 256>}]} {
    %c0 = arith.constant 0 : index
    %c0_0 = arith.constant 0 : index
    %0 = vector.load %arg1[%c0, %c0_0] : memref<4x256xf32, #tpu.memory_space<vmem>>, vector<4x256xf32>
    %c0_1 = arith.constant 0 : index
    %c0_2 = arith.constant 0 : index
    %1 = vector.load %arg2[%c0_1, %c0_2] : memref<40x128xf32, #tpu.memory_space<vmem>>, vector<40x128xf32>
    %2 = tpu.iota {dimensions = array<i32: 1>} : vector<1x256xi32>
    %c15_i32 = arith.constant 15 : i32
    %3 = vector.broadcast %c15_i32 : i32 to vector<1x256xi32>
    %4 = arith.andi %2, %3 : vector<1x256xi32>
    %5 = vector.extract_strided_slice %1 {offsets = [0, 8], sizes = [4, 1], strides = [1, 1]} : vector<40x128xf32> to vector<4x1xf32>
    %6 = vector.extract_strided_slice %1 {offsets = [0, 0], sizes = [4, 4], strides = [1, 1]} : vector<40x128xf32> to vector<4x4xf32>
    %cst = arith.constant dense<0.000000e+00> : vector<4x256xf32>
    %7 = tpu.matmul %6, %0, %cst {dimension_numbers = #tpu.dot_dimension_numbers<[1], [0], [0], [1], [0, 0, 1, 1], [], []>} : vector<4x4xf32>, vector<4x256xf32>, vector<4x256xf32> -> vector<4x256xf32>
    %8 = vector.extract_strided_slice %1 {offsets = [0, 4], sizes = [4, 4], strides = [1, 1]} : vector<40x128xf32> to vector<4x4xf32>
    %9 = vector.extract_strided_slice %0 {offsets = [0, 255], sizes = [4, 1], strides = [1, 1]} : vector<4x256xf32> to vector<4x1xf32>
    %10 = vector.extract_strided_slice %0 {offsets = [0, 0], sizes = [4, 255], strides = [1, 1]} : vector<4x256xf32> to vector<4x255xf32>
    %11 = tpu.concatenate %9, %10 in 1 : vector<4x1xf32>, vector<4x255xf32> -> vector<4x256xf32>
    %c1_i32 = arith.constant 1 : i32
    %12 = vector.broadcast %c1_i32 : i32 to vector<1x256xi32>
    %13 = arith.cmpi sge, %4, %12 : vector<1x256xi32>
    %cst_3 = arith.constant 0.000000e+00 : f32
    %14 = vector.shape_cast %13 : vector<1x256xi1> to vector<1x256xi1>
    %15 = vector.broadcast %14 : vector<1x256xi1> to vector<4x256xi1>
    %16 = vector.broadcast %cst_3 : f32 to vector<4x256xf32>
    %17 = arith.select %15, %11, %16 : vector<4x256xi1>, vector<4x256xf32>
    %cst_4 = arith.constant dense<0.000000e+00> : vector<4x256xf32>
    %18 = tpu.matmul %8, %17, %cst_4 {dimension_numbers = #tpu.dot_dimension_numbers<[1], [0], [0], [1], [0, 0, 1, 1], [], []>} : vector<4x4xf32>, vector<4x256xf32>, vector<4x256xf32> -> vector<4x256xf32>
    %19 = arith.addf %7, %18 : vector<4x256xf32>
    %20 = vector.broadcast %5 : vector<4x1xf32> to vector<4x256xf32>
    %21 = arith.addf %19, %20 : vector<4x256xf32>
    %cst_5 = arith.constant 0.000000e+00 : f32
    %22 = vector.broadcast %cst_5 : f32 to vector<4x256xf32>
    %23 = arith.maximumf %21, %22 : vector<4x256xf32>
    %24 = vector.extract_strided_slice %1 {offsets = [4, 8], sizes = [4, 1], strides = [1, 1]} : vector<40x128xf32> to vector<4x1xf32>
    %25 = vector.extract_strided_slice %1 {offsets = [4, 0], sizes = [4, 4], strides = [1, 1]} : vector<40x128xf32> to vector<4x4xf32>
    %cst_6 = arith.constant dense<0.000000e+00> : vector<4x256xf32>
    %26 = tpu.matmul %25, %23, %cst_6 {dimension_numbers = #tpu.dot_dimension_numbers<[1], [0], [0], [1], [0, 0, 1, 1], [], []>} : vector<4x4xf32>, vector<4x256xf32>, vector<4x256xf32> -> vector<4x256xf32>
    %27 = vector.extract_strided_slice %1 {offsets = [4, 4], sizes = [4, 4], strides = [1, 1]} : vector<40x128xf32> to vector<4x4xf32>
    %28 = vector.extract_strided_slice %23 {offsets = [0, 255], sizes = [4, 1], strides = [1, 1]} : vector<4x256xf32> to vector<4x1xf32>
    %29 = vector.extract_strided_slice %23 {offsets = [0, 0], sizes = [4, 255], strides = [1, 1]} : vector<4x256xf32> to vector<4x255xf32>
    %30 = tpu.concatenate %28, %29 in 1 : vector<4x1xf32>, vector<4x255xf32> -> vector<4x256xf32>
    %c1_i32_7 = arith.constant 1 : i32
    %31 = vector.broadcast %c1_i32_7 : i32 to vector<1x256xi32>
    %32 = arith.cmpi sge, %4, %31 : vector<1x256xi32>
    %cst_8 = arith.constant 0.000000e+00 : f32
    %33 = vector.shape_cast %32 : vector<1x256xi1> to vector<1x256xi1>
    %34 = vector.broadcast %33 : vector<1x256xi1> to vector<4x256xi1>
    %35 = vector.broadcast %cst_8 : f32 to vector<4x256xf32>
    %36 = arith.select %34, %30, %35 : vector<4x256xi1>, vector<4x256xf32>
    %cst_9 = arith.constant dense<0.000000e+00> : vector<4x256xf32>
    %37 = tpu.matmul %27, %36, %cst_9 {dimension_numbers = #tpu.dot_dimension_numbers<[1], [0], [0], [1], [0, 0, 1, 1], [], []>} : vector<4x4xf32>, vector<4x256xf32>, vector<4x256xf32> -> vector<4x256xf32>
    %38 = arith.addf %26, %37 : vector<4x256xf32>
    %39 = vector.broadcast %24 : vector<4x1xf32> to vector<4x256xf32>
    %40 = arith.addf %38, %39 : vector<4x256xf32>
    %cst_10 = arith.constant 0.000000e+00 : f32
    %41 = vector.broadcast %cst_10 : f32 to vector<4x256xf32>
    %42 = arith.maximumf %40, %41 : vector<4x256xf32>
    %43 = arith.addf %42, %0 : vector<4x256xf32>
    %44 = vector.extract_strided_slice %1 {offsets = [8, 8], sizes = [8, 1], strides = [1, 1]} : vector<40x128xf32> to vector<8x1xf32>
    %45 = vector.extract_strided_slice %1 {offsets = [8, 0], sizes = [8, 4], strides = [1, 1]} : vector<40x128xf32> to vector<8x4xf32>
    %cst_11 = arith.constant dense<0.000000e+00> : vector<8x256xf32>
    %46 = tpu.matmul %45, %43, %cst_11 {dimension_numbers = #tpu.dot_dimension_numbers<[1], [0], [0], [1], [0, 0, 1, 1], [], []>} : vector<8x4xf32>, vector<4x256xf32>, vector<8x256xf32> -> vector<8x256xf32>
    %47 = vector.extract_strided_slice %1 {offsets = [8, 4], sizes = [8, 4], strides = [1, 1]} : vector<40x128xf32> to vector<8x4xf32>
    %48 = vector.extract_strided_slice %43 {offsets = [0, 254], sizes = [4, 2], strides = [1, 1]} : vector<4x256xf32> to vector<4x2xf32>
    %49 = vector.extract_strided_slice %43 {offsets = [0, 0], sizes = [4, 254], strides = [1, 1]} : vector<4x256xf32> to vector<4x254xf32>
    %50 = tpu.concatenate %48, %49 in 1 : vector<4x2xf32>, vector<4x254xf32> -> vector<4x256xf32>
    %c2_i32 = arith.constant 2 : i32
    %51 = vector.broadcast %c2_i32 : i32 to vector<1x256xi32>
    %52 = arith.cmpi sge, %4, %51 : vector<1x256xi32>
    %cst_12 = arith.constant 0.000000e+00 : f32
    %53 = vector.shape_cast %52 : vector<1x256xi1> to vector<1x256xi1>
    %54 = vector.broadcast %53 : vector<1x256xi1> to vector<4x256xi1>
    %55 = vector.broadcast %cst_12 : f32 to vector<4x256xf32>
    %56 = arith.select %54, %50, %55 : vector<4x256xi1>, vector<4x256xf32>
    %cst_13 = arith.constant dense<0.000000e+00> : vector<8x256xf32>
    %57 = tpu.matmul %47, %56, %cst_13 {dimension_numbers = #tpu.dot_dimension_numbers<[1], [0], [0], [1], [0, 0, 1, 1], [], []>} : vector<8x4xf32>, vector<4x256xf32>, vector<8x256xf32> -> vector<8x256xf32>
    %58 = arith.addf %46, %57 : vector<8x256xf32>
    %59 = vector.broadcast %44 : vector<8x1xf32> to vector<8x256xf32>
    %60 = arith.addf %58, %59 : vector<8x256xf32>
    %cst_14 = arith.constant 0.000000e+00 : f32
    %61 = vector.broadcast %cst_14 : f32 to vector<8x256xf32>
    %62 = arith.maximumf %60, %61 : vector<8x256xf32>
    %63 = vector.extract_strided_slice %1 {offsets = [16, 16], sizes = [8, 1], strides = [1, 1]} : vector<40x128xf32> to vector<8x1xf32>
    %64 = vector.extract_strided_slice %1 {offsets = [16, 0], sizes = [8, 8], strides = [1, 1]} : vector<40x128xf32> to vector<8x8xf32>
    %cst_15 = arith.constant dense<0.000000e+00> : vector<8x256xf32>
    %65 = tpu.matmul %64, %62, %cst_15 {dimension_numbers = #tpu.dot_dimension_numbers<[1], [0], [0], [1], [0, 0, 1, 1], [], []>} : vector<8x8xf32>, vector<8x256xf32>, vector<8x256xf32> -> vector<8x256xf32>
    %66 = vector.extract_strided_slice %1 {offsets = [16, 8], sizes = [8, 8], strides = [1, 1]} : vector<40x128xf32> to vector<8x8xf32>
    %67 = vector.extract_strided_slice %62 {offsets = [0, 254], sizes = [8, 2], strides = [1, 1]} : vector<8x256xf32> to vector<8x2xf32>
    %68 = vector.extract_strided_slice %62 {offsets = [0, 0], sizes = [8, 254], strides = [1, 1]} : vector<8x256xf32> to vector<8x254xf32>
    %69 = tpu.concatenate %67, %68 in 1 : vector<8x2xf32>, vector<8x254xf32> -> vector<8x256xf32>
    %c2_i32_16 = arith.constant 2 : i32
    %70 = vector.broadcast %c2_i32_16 : i32 to vector<1x256xi32>
    %71 = arith.cmpi sge, %4, %70 : vector<1x256xi32>
    %cst_17 = arith.constant 0.000000e+00 : f32
    %72 = vector.shape_cast %71 : vector<1x256xi1> to vector<1x256xi1>
    %73 = vector.broadcast %72 : vector<1x256xi1> to vector<8x256xi1>
    %74 = vector.broadcast %cst_17 : f32 to vector<8x256xf32>
    %75 = arith.select %73, %69, %74 : vector<8x256xi1>, vector<8x256xf32>
    %cst_18 = arith.constant dense<0.000000e+00> : vector<8x256xf32>
    %76 = tpu.matmul %66, %75, %cst_18 {dimension_numbers = #tpu.dot_dimension_numbers<[1], [0], [0], [1], [0, 0, 1, 1], [], []>} : vector<8x8xf32>, vector<8x256xf32>, vector<8x256xf32> -> vector<8x256xf32>
    %77 = arith.addf %65, %76 : vector<8x256xf32>
    %78 = vector.broadcast %63 : vector<8x1xf32> to vector<8x256xf32>
    %79 = arith.addf %77, %78 : vector<8x256xf32>
    %cst_19 = arith.constant 0.000000e+00 : f32
    %80 = vector.broadcast %cst_19 : f32 to vector<8x256xf32>
    %81 = arith.maximumf %79, %80 : vector<8x256xf32>
    %82 = vector.extract_strided_slice %1 {offsets = [24, 0], sizes = [8, 4], strides = [1, 1]} : vector<40x128xf32> to vector<8x4xf32>
    %83 = vector.extract_strided_slice %1 {offsets = [24, 4], sizes = [8, 1], strides = [1, 1]} : vector<40x128xf32> to vector<8x1xf32>
    %cst_20 = arith.constant dense<0.000000e+00> : vector<8x256xf32>
    %84 = tpu.matmul %82, %43, %cst_20 {dimension_numbers = #tpu.dot_dimension_numbers<[1], [0], [0], [1], [0, 0, 1, 1], [], []>} : vector<8x4xf32>, vector<4x256xf32>, vector<8x256xf32> -> vector<8x256xf32>
    %85 = vector.broadcast %83 : vector<8x1xf32> to vector<8x256xf32>
    %86 = arith.addf %84, %85 : vector<8x256xf32>
    %87 = arith.addf %81, %86 : vector<8x256xf32>
    %88 = vector.extract_strided_slice %1 {offsets = [32, 16], sizes = [1, 1], strides = [1, 1]} : vector<40x128xf32> to vector<1x1xf32>
    %89 = vector.extract_strided_slice %1 {offsets = [32, 0], sizes = [1, 8], strides = [1, 1]} : vector<40x128xf32> to vector<1x8xf32>
    %cst_21 = arith.constant dense<0.000000e+00> : vector<1x256xf32>
    %90 = tpu.matmul %89, %87, %cst_21 {dimension_numbers = #tpu.dot_dimension_numbers<[1], [0], [0], [1], [0, 0, 1, 1], [], []>} : vector<1x8xf32>, vector<8x256xf32>, vector<1x256xf32> -> vector<1x256xf32>
    %91 = vector.extract_strided_slice %1 {offsets = [32, 8], sizes = [1, 8], strides = [1, 1]} : vector<40x128xf32> to vector<1x8xf32>
    %92 = vector.extract_strided_slice %87 {offsets = [0, 252], sizes = [8, 4], strides = [1, 1]} : vector<8x256xf32> to vector<8x4xf32>
    %93 = vector.extract_strided_slice %87 {offsets = [0, 0], sizes = [8, 252], strides = [1, 1]} : vector<8x256xf32> to vector<8x252xf32>
    %94 = tpu.concatenate %92, %93 in 1 : vector<8x4xf32>, vector<8x252xf32> -> vector<8x256xf32>
    %c4_i32 = arith.constant 4 : i32
    %95 = vector.broadcast %c4_i32 : i32 to vector<1x256xi32>
    %96 = arith.cmpi sge, %4, %95 : vector<1x256xi32>
    %cst_22 = arith.constant 0.000000e+00 : f32
    %97 = vector.shape_cast %96 : vector<1x256xi1> to vector<1x256xi1>
    %98 = vector.broadcast %97 : vector<1x256xi1> to vector<8x256xi1>
    %99 = vector.broadcast %cst_22 : f32 to vector<8x256xf32>
    %100 = arith.select %98, %94, %99 : vector<8x256xi1>, vector<8x256xf32>
    %cst_23 = arith.constant dense<0.000000e+00> : vector<1x256xf32>
    %101 = tpu.matmul %91, %100, %cst_23 {dimension_numbers = #tpu.dot_dimension_numbers<[1], [0], [0], [1], [0, 0, 1, 1], [], []>} : vector<1x8xf32>, vector<8x256xf32>, vector<1x256xf32> -> vector<1x256xf32>
    %102 = arith.addf %90, %101 : vector<1x256xf32>
    %103 = vector.broadcast %88 : vector<1x1xf32> to vector<1x256xf32>
    %104 = arith.addf %102, %103 : vector<1x256xf32>
    %cst_24 = arith.constant 0.000000e+00 : f32
    %105 = vector.broadcast %cst_24 : f32 to vector<1x256xf32>
    %106 = arith.maximumf %104, %105 : vector<1x256xf32>
    %107 = vector.extract_strided_slice %1 {offsets = [33, 2], sizes = [1, 1], strides = [1, 1]} : vector<40x128xf32> to vector<1x1xf32>
    %108 = vector.extract_strided_slice %1 {offsets = [33, 0], sizes = [1, 1], strides = [1, 1]} : vector<40x128xf32> to vector<1x1xf32>
    %cst_25 = arith.constant dense<0.000000e+00> : vector<1x256xf32>
    %109 = tpu.matmul %108, %106, %cst_25 {dimension_numbers = #tpu.dot_dimension_numbers<[1], [0], [0], [1], [0, 0, 1, 1], [], []>} : vector<1x1xf32>, vector<1x256xf32>, vector<1x256xf32> -> vector<1x256xf32>
    %110 = vector.extract_strided_slice %1 {offsets = [33, 1], sizes = [1, 1], strides = [1, 1]} : vector<40x128xf32> to vector<1x1xf32>
    %111 = vector.extract_strided_slice %106 {offsets = [0, 252], sizes = [1, 4], strides = [1, 1]} : vector<1x256xf32> to vector<1x4xf32>
    %112 = vector.extract_strided_slice %106 {offsets = [0, 0], sizes = [1, 252], strides = [1, 1]} : vector<1x256xf32> to vector<1x252xf32>
    %113 = tpu.concatenate %111, %112 in 1 : vector<1x4xf32>, vector<1x252xf32> -> vector<1x256xf32>
    %c4_i32_26 = arith.constant 4 : i32
    %114 = vector.broadcast %c4_i32_26 : i32 to vector<1x256xi32>
    %115 = arith.cmpi sge, %4, %114 : vector<1x256xi32>
    %cst_27 = arith.constant 0.000000e+00 : f32
    %116 = vector.broadcast %cst_27 : f32 to vector<1x256xf32>
    %117 = arith.select %115, %113, %116 : vector<1x256xi1>, vector<1x256xf32>
    %cst_28 = arith.constant dense<0.000000e+00> : vector<1x256xf32>
    %118 = tpu.matmul %110, %117, %cst_28 {dimension_numbers = #tpu.dot_dimension_numbers<[1], [0], [0], [1], [0, 0, 1, 1], [], []>} : vector<1x1xf32>, vector<1x256xf32>, vector<1x256xf32> -> vector<1x256xf32>
    %119 = arith.addf %109, %118 : vector<1x256xf32>
    %120 = vector.broadcast %107 : vector<1x1xf32> to vector<1x256xf32>
    %121 = arith.addf %119, %120 : vector<1x256xf32>
    %cst_29 = arith.constant 0.000000e+00 : f32
    %122 = vector.broadcast %cst_29 : f32 to vector<1x256xf32>
    %123 = arith.maximumf %121, %122 : vector<1x256xf32>
    %124 = vector.extract_strided_slice %1 {offsets = [34, 0], sizes = [1, 8], strides = [1, 1]} : vector<40x128xf32> to vector<1x8xf32>
    %125 = vector.extract_strided_slice %1 {offsets = [34, 8], sizes = [1, 1], strides = [1, 1]} : vector<40x128xf32> to vector<1x1xf32>
    %cst_30 = arith.constant dense<0.000000e+00> : vector<1x256xf32>
    %126 = tpu.matmul %124, %87, %cst_30 {dimension_numbers = #tpu.dot_dimension_numbers<[1], [0], [0], [1], [0, 0, 1, 1], [], []>} : vector<1x8xf32>, vector<8x256xf32>, vector<1x256xf32> -> vector<1x256xf32>
    %127 = vector.broadcast %125 : vector<1x1xf32> to vector<1x256xf32>
    %128 = arith.addf %126, %127 : vector<1x256xf32>
    %129 = arith.addf %123, %128 : vector<1x256xf32>
    %c0_31 = arith.constant 0 : index
    %c0_32 = arith.constant 0 : index
    %130 = vector.load %arg3[%c0_31, %c0_32] : memref<1x256xf32, #tpu.memory_space<vmem>>, vector<1x256xf32>
    tpu.vector_store %arg3[%c0_31, %c0_32], %129 {strides = array<i32>} : memref<1x256xf32, #tpu.memory_space<vmem>>, vector<1x256xf32>,
    return
  }
  func.func @transform_0(%arg0: i32) -> (i32, i32) {
    %c0_i32 = arith.constant 0 : i32
    %c0_i32_0 = arith.constant 0 : i32
    return %c0_i32, %arg0 : i32, i32
  }
  func.func @transform_1(%arg0: i32) -> (i32, i32) {
    %c0_i32 = arith.constant 0 : i32
    %c0_i32_0 = arith.constant 0 : i32
    %c0_i32_1 = arith.constant 0 : i32
    return %c0_i32, %c0_i32_0 : i32, i32
  }
  func.func @transform_2(%arg0: i32) -> (i32, i32) {
    %c0_i32 = arith.constant 0 : i32
    %c0_i32_0 = arith.constant 0 : i32
    return %c0_i32, %arg0 : i32, i32
  }
}

</mosaic_0001>

<bundles_post_ra>
// kernel: tpu_custom_call.1
= control target key start
LH: loop header
LB: loop body
LE: loop exit
PB: predicated region body
PF: predicated region fallthrough
CT: control target
= control target key end

     0   :  { %7 = vsyncpa [#allocation3], 0  ;;  %s1643_s0 = inlined_call_operand.hbm [shape: f32[4,256], index: 0, kind: input, shape index: {}]   ;;  %s1644_s1 = inlined_call_operand.hbm [shape: f32[40,128], index: 1, kind: input, shape index: {}]   ;;  %s1645_s2 = inlined_call_operand.hbm [shape: f32[1,256], index: 2, kind: output, shape index: {}]  }
   0x1   :  { %8 = vsyncpa [#allocation6], 0 }
   0x2   :  { %9 = vsyncpa [#allocation4], 0  ;;  %s1461_s9 = smov [#allocation2]   ;;  %s1462_s11 = smov [#allocation5]  }
   0x3   :  { %s16_s10 = sshll.u32 %s1461_s9, 4  ;;  %s25_s12 = sshll.u32 %s1462_s11, 4  ;;  %s17_s10 = int_to_ptr.vmem [resolvable:$true] %s16_s10  ;;  %s26_s12 = int_to_ptr.vmem [resolvable:$true] %s25_s12 }
   0x4   :  { %s1403_s13 = scalar_lea.vmem %s17_s10, 128  ;;  %p1408_p1 = scmp.lt.s32.totalorder %s17_s10, %s17_s10 }
   0x5   :  { %p1404_p0 = scmp.ne.s32.totalorder %s17_s10, %s1403_s13  ;;  %p1409_p2 = scmp.lt.s32.totalorder %s1403_s13, %s1403_s13 }
   0x7   :  { %p1410_p3 = por %p1409_p2, %p1408_p1 }
   0x9   :  { %p1411_p4 = pnand %p1410_p3, %p1404_p0 }
   0xb   :  { %1414 = shalt.err (!%p1411_p4)
}
   0xc   :  { %19 = dma.hbm_to_vmem [thread:$0]  %s1643_s0, 128, %s17_s10, [#allocation3]  }
   0xd   :  { %s1423_s16 = scalar_lea.vmem %s26_s12, 640  ;;  %p1428_p6 = scmp.lt.s32.totalorder %s26_s12, %s26_s12 }
   0xe   :  { %p1424_p5 = scmp.ne.s32.totalorder %s26_s12, %s1423_s16  ;;  %p1429_p7 = scmp.lt.s32.totalorder %s1423_s16, %s1423_s16 }
  0x10   :  { %p1430_p8 = por %p1429_p7, %p1428_p6 }
  0x12   :  { %p1431_p9 = pnand %p1430_p8, %p1424_p5 }
  0x14   :  { %1434 = shalt.err (!%p1431_p9)
}
  0x15   :  { %s1463_s17 = smov 128   ;;  %s1464_s18 = smov 8  }
  0x16   :  { %31 = dma.hbm_to_vmem [thread:$0]  %s1644_s1, 640, %s26_s12, [#allocation6], %s1463_s17, %s1463_s17, %s1464_s18  }
  0x17   :  { %1455 = dma.done.wait [#allocation3], 128  }
  0x18   :  { %1456 = vsyncadd [#allocation3], 4294967168 }
  0x19   :  { %1457 = dma.done.wait [#allocation6], 640  }
  0x1a   :  { %1458 = vsyncadd [#allocation6], 4294966656  ;;  %v1465_v0 = vmov 0.0   ;;  %v1466_v1 = vmov 8   ;;  %v1503_v2 = vld [vmem:[#allocation2] sm:$0xff]  ;;  %v39_v3 = vld [vmem:[#allocation5] sm:$0xff]  ;;  %v44_v5 = vlaneseq }
  0x1b   :  { %223 = vmatprep.mubr.f32.mxu1 %v1465_v0  ;;  %146 = vmatprep.mubr.f32.mxu0 %v1465_v0  ;;  %vm75_vm0 = vcmask 1043456   ;;  %v1507_v4 = vcombine.high %v1503_v2, %v1503_v2  ;;  %s1467_s0 = smov 124   ;;  %vm72_vm1 = vcmask 31744   ;;  %s1468_s1 = smov 1   ;;  %vm56_vm2 = vcmask 7168   ;;  %v40_v49 = vld [vmem:[#allocation5 + $0x8] sm:$0xff] }
  0x1c   :  { %1388 = vset.pattern.permute.xlu1 %v1466_v1  ;;  %1389 = vset.pattern.permute.xlu0 %v1466_v1  ;;  %v45_v6 = vand.u32 127, %v44_v5  ;;  %v251_v28 = vrot.slane %v39_v3, 4  ;;  %s1469_s21 = smov 2   ;;  %vm426_vm5 = vcmask 15360   ;;  %v41_v57 = vld [vmem:[#allocation5 + $0x10] sm:$0xff]  ;;  %s1470_s22 = smov 120  }
  0x1d   :  { %70 = vrot.lane.b32.xlu1 %v39_v3, %s1467_s0  ;;  %51 = vrot.lane.b32.xlu0 %v1507_v4, %s1468_s1  ;;  %vm622_vm8 = vcmask 64512   ;;  %s1473_s23 = smov 4   ;;  %vm1051_vm11 = vcmask 1040384   ;;  %s1475_s24 = smov 127   ;;  %vm1316_vm12 = vcmp.lt.s32.totalorder %v44_v5, 256 }
  0x1e   :  { %1338 = vmatprep.subr.msk.mxu1 %vm75_vm0, %v1507_v4  ;;  %v46_v7 = vadd.s32 128, %v45_v6  ;;  %v1523_v9 = vand.u32 15, %v45_v6  ;;  %s1477_s25 = smov [#allocation7]  }
  0x1f   :  { %1339 = vmatpush1.msk.msra.mxu1 %vm75_vm0, %v1503_v2  ;;  %s1325_s26 = sshll.u32 %s1477_s25, 4  ;;  %s1326_s26 = int_to_ptr.vmem [resolvable:$true] %s1325_s26 }
  0x20   :  { %1340 = vmatmul.mubr.msk.f32.vlgmr.msra.gmra.mxu1 %vm72_vm1, %v39_v3  ;;  %v1521_v8 = vand.u32 15, %v46_v7  ;;  %vm61_vm4 = vcmp.ge.s32.totalorder %v1523_v9, 1  ;;  %vm431_vm6 = vcmp.ge.s32.totalorder %v1523_v9, 2  ;;  %vm868_vm10 = vcmp.ge.s32.totalorder %v1523_v9, 4  ;;  %s1435_s27 = scalar_lea.vmem %s1326_s26, 32  ;;  %p1440_p11 = scmp.lt.s32.totalorder %s1326_s26, %s1326_s26 }
  0x21   :  { %231 = vperm.xlu1 %1388, %v39_v3   ;;  %403 = vmatprep.mubr.f32.mxu1 %v1465_v0  ;;  %p1436_p10 = scmp.ne.s32.totalorder %s1326_s26, %s1435_s27  ;;  %p1441_p12 = scmp.lt.s32.totalorder %s1435_s27, %s1435_s27 }
  0x22   :  { %54 = vrot.lane.b32.xlu0 %v1503_v2, %s1468_s1  ;;  %vm62_vm3 = vcmp.ge.s32.totalorder %v1521_v8, 1  ;;  %vm432_vm7 = vcmp.ge.s32.totalorder %v1521_v8, 2  ;;  %vm869_vm9 = vcmp.ge.s32.totalorder %v1521_v8, 4 }
  0x23   :  { %p1442_p13 = por %p1441_p12, %p1440_p11 }
  0x25   :  { %p1443_p0 = pnand %p1442_p13, %p1436_p10 }
  0x8f   :  { %v52_v10 = vpop.permute.xlu0 %51  ;;  %v71_v15 = vpop.permute.xlu1 %70 }
  0x94   :  { %v55_v11 = vpop.permute.xlu0 %54 }
  0x95   :  { %v60_v12 = vsel %vm56_vm2, %v52_v10, %v55_v11  ;;  %v57_v13 = vsel %vm56_vm2, %v55_v11, %v52_v10  ;;  %v1471_v10 = vmov 16   ;;  %v1472_v11 = vmov 4  }
  0x96   :  { %v68_v14 = vsel %vm62_vm3, %v57_v13, 0.0  ;;  %v67_v16 = vsel %vm61_vm4, %v60_v12, 0.0  ;;  %1390 = vset.pattern.permute.xlu1 %v1471_v10  ;;  %v42_v12 = vld [vmem:[#allocation5 + $0x18] sm:$0xff] }
  0x97   :  { %1335 = vmatprep.subr.msk.mxu0 %vm75_vm0, %v68_v14 }
  0x98   :  { %1336 = vmatpush1.msk.msra.mxu0 %vm75_vm0, %v67_v16 }
  0x99   :  { %1337 = vmatmul.mubr.msk.f32.vlgmr.msra.gmra.mxu0 %vm72_vm1, %v71_v15 }
  0x9a   :  { %326 = vmatprep.mubr.f32.mxu0 %v1465_v0 }
  0x9c   :  { %v232_v19 = vpop.permute.xlu1 %231 }
  0x9d   :  { %v410_v38 = vrot.slane %v232_v19, 4 }
  0xe0   :  { %v225_v17 = vpop.f32.mrf.mxu1 }
  0xe2   :  { %v227_v21 = vpop.f32.mrf.mxu1 }
 0x159   :  { %v148_v18 = vpop.f32.mrf.mxu0 }
 0x15a   :  { %v226_v20 = vadd.f32 %v225_v17, %v148_v18 }
 0x15b   :  { %v150_v22 = vpop.f32.mrf.mxu0 }
 0x15c   :  { %v234_v23 = vadd.f32 %v232_v19, %v226_v20  ;;  %v228_v24 = vadd.f32 %v227_v21, %v150_v22 }
 0x15e   :  { %v235_v25 = vadd.f32 %v232_v19, %v228_v24  ;;  %v236_v26 = vmax.f32 %v234_v23, 0.0 }
 0x160   :  { %v237_v27 = vmax.f32 %v235_v25, 0.0  ;;  %243 = vrot.lane.b32.xlu1 %v236_v26, %s1468_s1 }
 0x162   :  { %239 = vrot.lane.b32.xlu0 %v237_v27, %s1468_s1  ;;  %1344 = vmatprep.subr.msk.mxu1 %vm75_vm0, %v237_v27 }
 0x163   :  { %1345 = vmatpush1.msk.msra.mxu1 %vm75_vm0, %v236_v26 }
 0x164   :  { %1346 = vmatmul.mubr.msk.f32.vlgmr.msra.gmra.mxu1 %vm72_vm1, %v251_v28 }
 0x165   :  { %591 = vmatprep.mubr.f32.mxu1 %v1465_v0 }
 0x166   :  { %252 = vrot.lane.b32.xlu0 %v251_v28, %s1467_s0 }
 0x1d2   :  { %v244_v29 = vpop.permute.xlu1 %243 }
 0x1d4   :  { %v240_v30 = vpop.permute.xlu0 %239 }
 0x1d5   :  { %v245_v31 = vsel %vm56_vm2, %v244_v29, %v240_v30  ;;  %v248_v32 = vsel %vm56_vm2, %v240_v30, %v244_v29 }
 0x1d6   :  { %v249_v33 = vsel %vm61_vm4, %v248_v32, 0.0  ;;  %v250_v34 = vsel %vm62_vm3, %v245_v31, 0.0 }
 0x1d7   :  { %1341 = vmatprep.subr.msk.mxu0 %vm75_vm0, %v250_v34 }
 0x1d8   :  { %v253_v35 = vpop.permute.xlu0 %252  ;;  %1342 = vmatpush1.msk.msra.mxu0 %vm75_vm0, %v249_v33 }
 0x1d9   :  { %1343 = vmatmul.mubr.msk.f32.vlgmr.msra.gmra.mxu0 %vm72_vm1, %v253_v35 }
 0x1da   :  { %514 = vmatprep.mubr.f32.mxu0 %v1465_v0 }
 0x224   :  { %v405_v36 = vpop.f32.mrf.mxu1 }
 0x226   :  { %v407_v40 = vpop.f32.mrf.mxu1 }
 0x299   :  { %v328_v37 = vpop.f32.mrf.mxu0 }
 0x29a   :  { %v406_v39 = vadd.f32 %v405_v36, %v328_v37 }
 0x29b   :  { %v330_v41 = vpop.f32.mrf.mxu0 }
 0x29c   :  { %v412_v42 = vadd.f32 %v410_v38, %v406_v39  ;;  %v408_v43 = vadd.f32 %v407_v40, %v330_v41 }
 0x29e   :  { %v414_v44 = vmax.f32 %v412_v42, 0.0  ;;  %v413_v45 = vadd.f32 %v410_v38, %v408_v43 }
 0x2a0   :  { %v415_v46 = vmax.f32 %v413_v45, 0.0  ;;  %v1555_v47 = vadd.f32 %v414_v44, %v1503_v2 }
 0x2a2   :  { %424 = vrot.lane.b32.xlu0 %v1555_v47, %s1469_s21  ;;  %v418_v48 = vadd.f32 %v415_v46, %v1507_v4 }
 0x2a4   :  { %420 = vrot.lane.b32.xlu1 %v418_v48, %s1469_s21  ;;  %1350 = vmatprep.subr.msk.mxu1 %vm75_vm0, %v418_v48 }
 0x2a5   :  { %1351 = vmatpush1.msk.msra.mxu1 %vm75_vm0, %v1555_v47 }
 0x2a6   :  { %1352 = vmatmul.mubr.msk.f32.vlgmr.msra.gmra.mxu1 %vm72_vm1, %v40_v49  ;;  %599 = vperm.xlu0 %1389, %v40_v49  }
 0x2a7   :  { %762 = vmatprep.mubr.f32.mxu1 %v1465_v0 }
 0x2a8   :  { %440 = vrot.lane.b32.xlu1 %v40_v49, %s1467_s0 }
 0x2aa   :  { %620 = vrot.lane.b32.xlu0 %v41_v57, %s1470_s22 }
 0x2ab   :  { %1391 = vset.pattern.permute.xlu0 %v1472_v11 }
 0x2ae   :  { %779 = vperm.xlu0 %1391, %v42_v12  }
 0x2b2   :  { %1393 = vset.pattern.permute.xlu0 %v1466_v1  ;;  %v1598_v1 = vld [vmem:[#allocation5 + $0x20] sm:$0xff] }
 0x2b3   :  { %877 = vrot.lane.b32.xlu0 %v1598_v1, %s1470_s22 }
 0x314   :  { %v425_v50 = vpop.permute.xlu0 %424 }
 0x316   :  { %v421_v51 = vpop.permute.xlu1 %420 }
 0x317   :  { %v427_v52 = vsel %vm426_vm5, %v425_v50, %v421_v51  ;;  %v430_v53 = vsel %vm426_vm5, %v421_v51, %v425_v50  ;;  %v1474_v51 = vmov 2  }
 0x318   :  { %v437_v54 = vsel %vm431_vm6, %v430_v53, 0.0  ;;  %v438_v55 = vsel %vm432_vm7, %v427_v52, 0.0  ;;  %v1046_v53 = vrot.slane %v1598_v1, 1 }
 0x319   :  { %1347 = vmatprep.subr.msk.mxu0 %vm75_vm0, %v438_v55 }
 0x31a   :  { %v441_v56 = vpop.permute.xlu1 %440  ;;  %1348 = vmatpush1.msk.msra.mxu0 %vm75_vm0, %v437_v54 }
 0x31b   :  { %1349 = vmatmul.mubr.msk.f32.vlgmr.msra.gmra.mxu0 %vm72_vm1, %v441_v56 }
 0x31c   :  { %689 = vmatprep.mubr.f32.mxu0 %v1465_v0 }
 0x321   :  { %v600_v61 = vpop.permute.xlu0 %599 }
 0x325   :  { %v621_v17 = vpop.permute.xlu0 %620 }
 0x329   :  { %v780_v26 = vpop.permute.xlu0 %779 }
 0x32d   :  { %v878_v40 = vpop.permute.xlu0 %877 }
 0x366   :  { %v593_v58 = vpop.f32.mrf.mxu1 }
 0x368   :  { %v595_v62 = vpop.f32.mrf.mxu1 }
 0x3db   :  { %v516_v59 = vpop.f32.mrf.mxu0 }
 0x3dc   :  { %v594_v60 = vadd.f32 %v593_v58, %v516_v59 }
 0x3dd   :  { %v518_v63 = vpop.f32.mrf.mxu0 }
 0x3de   :  { %v596_v2 = vadd.f32 %v595_v62, %v518_v63  ;;  %v602_v3 = vadd.f32 %v600_v61, %v594_v60 }
 0x3e0   :  { %v603_v4 = vadd.f32 %v600_v61, %v596_v2  ;;  %v604_v7 = vmax.f32 %v602_v3, 0.0  ;;  %v1218_v61 = vrot.slane %v1598_v1, 2  ;;  %v1476_v3 = vmov 1966171168  }
 0x3e2   :  { %v605_v6 = vmax.f32 %v603_v4, 0.0  ;;  %v1300_v4 = vunpack.c.l.s4 %v1476_v3 }
 0x3e4   :  { %607 = vrot.lane.b32.xlu1 %v605_v6, %s1469_s21  ;;  %728 = vmatprep.subr.mxu1 %v605_v6 }
 0x3e5   :  { %729 = vmatpush1.msra.mxu1 %v604_v7 }
 0x3e6   :  { %1356 = vmatmul.mubr.msk.f32.vlgmr.msra.gmra.mxu1 %vm622_vm8, %v41_v57 }
 0x3e7   :  { %945 = vmatprep.mubr.f32.mxu1 %v1465_v0 }
 0x3e8   :  { %611 = vrot.lane.b32.xlu1 %v604_v7, %s1469_s21 }
 0x3ec   :  { %770 = vperm.xlu1 %1390, %v41_v57  }
 0x456   :  { %v608_v13 = vpop.permute.xlu1 %607 }
 0x45a   :  { %v612_v14 = vpop.permute.xlu1 %611 }
 0x45b   :  { %v613_v15 = vsel %vm426_vm5, %v612_v14, %v608_v13  ;;  %v616_v16 = vsel %vm426_vm5, %v608_v13, %v612_v14 }
 0x45c   :  { %1353 = vmatprep.subr.msk.mxu0 %vm432_vm7, %v613_v15  ;;  %v1301_v15 = vunpack.c.0.s8 %v1300_v4 }
 0x45d   :  { %1354 = vmatpush1.msk.msra.mxu0 %vm431_vm6, %v616_v16 }
 0x45e   :  { %1355 = vmatmul.mubr.msk.f32.vlgmr.msra.gmra.mxu0 %vm622_vm8, %v621_v17  ;;  %1357 = vmatprep.subr.msk.mxu0 %vm75_vm0, %v418_v48 }
 0x45f   :  { %1358 = vmatpush1.msk.msra.mxu0 %vm75_vm0, %v1555_v47  ;;  %848 = vmatprep.mubr.f32.mxu0 %v1465_v0 }
 0x462   :  { %1359 = vmatmul.mubr.msk.f32.vlgmr.msra.gmra.mxu0 %vm72_vm1, %v42_v12 }
 0x463   :  { %1018 = vmatprep.mubr.f32.mxu0 %v1465_v0 }
 0x467   :  { %v771_v20 = vpop.permute.xlu1 %770 }
 0x4a6   :  { %v764_v18 = vpop.f32.mrf.mxu1 }
 0x4a8   :  { %v766_v22 = vpop.f32.mrf.mxu1 }
 0x51e   :  { %v691_v19 = vpop.f32.mrf.mxu0 }
 0x51f   :  { %v765_v21 = vadd.f32 %v764_v18, %v691_v19 }
 0x520   :  { %v693_v23 = vpop.f32.mrf.mxu0 }
 0x521   :  { %v767_v24 = vadd.f32 %v766_v22, %v693_v23  ;;  %v773_v25 = vadd.f32 %v771_v20, %v765_v21 }
 0x522   :  { %v850_v27 = vpop.f32.mrf.mxu0 }
 0x523   :  { %v774_v28 = vadd.f32 %v771_v20, %v767_v24  ;;  %v775_v29 = vmax.f32 %v773_v25, 0.0  ;;  %v851_v30 = vadd.f32 %v850_v27, %v780_v26 }
 0x524   :  { %v852_v31 = vpop.f32.mrf.mxu0 }
 0x525   :  { %v776_v32 = vmax.f32 %v774_v28, 0.0  ;;  %v853_v33 = vadd.f32 %v852_v31, %v780_v26  ;;  %v855_v35 = vadd.f32 %v851_v30, %v775_v29 }
 0x527   :  { %v856_v34 = vadd.f32 %v853_v33, %v776_v32 }
 0x529   :  { %858 = vrot.lane.b32.xlu1 %v856_v34, %s1473_s23  ;;  %984 = vmatprep.subr.mxu0 %v856_v34 }
 0x52a   :  { %985 = vmatpush1.msra.mxu0 %v855_v35 }
 0x52b   :  { %1363 = vmatmul.mubr.msk.f32.vlgmr.msra.gmra.mxu0 %vm622_vm8, %v1598_v1 }
 0x52c   :  { %1199 = vmatprep.mubr.f32.mxu0 %v1465_v0 }
 0x52d   :  { %862 = vrot.lane.b32.xlu1 %v855_v35, %s1473_s23 }
 0x531   :  { %1026 = vperm.xlu1 %1390, %v1598_v1  }
 0x535   :  { %1392 = vset.pattern.permute.xlu1 %v1474_v51 }
 0x59b   :  { %v859_v36 = vpop.permute.xlu1 %858 }
 0x59f   :  { %v863_v37 = vpop.permute.xlu1 %862 }
 0x5a0   :  { %v864_v38 = vsel %vm72_vm1, %v863_v37, %v859_v36  ;;  %v867_v39 = vsel %vm72_vm1, %v859_v36, %v863_v37 }
 0x5a1   :  { %1360 = vmatprep.subr.msk.mxu1 %vm869_vm9, %v864_v38 }
 0x5a2   :  { %1361 = vmatpush1.msk.msra.mxu1 %vm868_vm10, %v867_v39 }
 0x5a3   :  { %1362 = vmatmul.mubr.msk.f32.vlgmr.msra.gmra.mxu1 %vm622_vm8, %v878_v40 }
 0x5a4   :  { %1122 = vmatprep.mubr.f32.mxu1 %v1465_v0 }
 0x5ac   :  { %v1027_v43 = vpop.permute.xlu1 %1026 }
 0x5eb   :  { %v1020_v41 = vpop.f32.mrf.mxu0 }
 0x5ed   :  { %v1022_v45 = vpop.f32.mrf.mxu0 }
 0x663   :  { %v947_v42 = vpop.f32.mrf.mxu1 }
 0x664   :  { %v1021_v44 = vadd.f32 %v1020_v41, %v947_v42 }
 0x665   :  { %v949_v46 = vpop.f32.mrf.mxu1 }
 0x666   :  { %v1029_v47 = vadd.f32 %v1027_v43, %v1021_v44  ;;  %v1023_v48 = vadd.f32 %v1022_v45, %v949_v46 }
 0x668   :  { %v1031_v49 = vmax.f32 %v1029_v47, 0.0  ;;  %v1030_v50 = vadd.f32 %v1027_v43, %v1023_v48 }
 0x66a   :  { %v1032_v52 = vmax.f32 %v1030_v50, 0.0  ;;  %1038 = vrot.lane.b32.xlu1 %v1031_v49, %s1473_s23 }
 0x66c   :  { %1034 = vrot.lane.b32.xlu0 %v1032_v52, %s1473_s23  ;;  %1367 = vmatprep.subr.msk.mxu0 %vm1051_vm11, %v1032_v52 }
 0x66d   :  { %1368 = vmatpush1.msk.msra.mxu0 %vm1051_vm11, %v1031_v49 }
 0x66e   :  { %1369 = vmatmul.mubr.msk.f32.vlgmr.msra.gmra.mxu0 %vm56_vm2, %v1046_v53  ;;  %1207 = vperm.xlu1 %1392, %v1598_v1  }
 0x670   :  { %1047 = vrot.lane.b32.xlu0 %v1046_v53, %s1475_s24 }
 0x674   :  { %1216 = vperm.xlu0 %1393, %v1598_v1   ;;  %v1303_v1 = vshrl.u32 %v44_v5, 7 }
 0x676   :  { %v1304_v23 = vsub.s32 %v1301_v15, %v1303_v1 }
 0x6dc   :  { %v1039_v54 = vpop.permute.xlu1 %1038 }
 0x6de   :  { %v1035_v55 = vpop.permute.xlu0 %1034 }
 0x6df   :  { %v1040_v56 = vsel %vm72_vm1, %v1039_v54, %v1035_v55  ;;  %v1043_v57 = vsel %vm72_vm1, %v1035_v55, %v1039_v54 }
 0x6e0   :  { %v1044_v58 = vsel %vm868_vm10, %v1043_v57, 0.0  ;;  %v1045_v59 = vsel %vm869_vm9, %v1040_v56, 0.0 }
 0x6e1   :  { %1364 = vmatprep.subr.msk.mxu1 %vm1051_vm11, %v1045_v59 }
 0x6e2   :  { %1365 = vmatpush1.msk.msra.mxu1 %vm1051_vm11, %v1044_v58  ;;  %v1048_v60 = vpop.permute.xlu0 %1047 }
 0x6e3   :  { %1253 = vmatprep.subr.mxu1 %v856_v34  ;;  %1366 = vmatmul.mubr.msk.f32.vlgmr.msra.gmra.mxu1 %vm56_vm2, %v1048_v60 }
 0x6e4   :  { %1254 = vmatpush1.msra.mxu1 %v855_v35  ;;  %1287 = vmatprep.mubr.f32.mxu1 %v1465_v0 }
 0x6e7   :  { %1370 = vmatmul.mubr.msk.f32.vlgmr.msra.gmra.mxu1 %vm622_vm8, %v1218_v61 }
 0x6e9   :  { %v1208_v9 = vpop.permute.xlu1 %1207 }
 0x6ea   :  { %v1209_v8 = vrot.slane %v1208_v9, 1 }
 0x6ef   :  { %v1217_v63 = vpop.permute.xlu0 %1216 }
 0x6f0   :  { %v1219_v7 = vrot.slane %v1217_v63, 2 }
 0x72e   :  { %v1201_v62 = vpop.f32.mrf.mxu0 }
 0x730   :  { %v1203_v11 = vpop.f32.mrf.mxu0 }
 0x7a3   :  { %v1124_v2 = vpop.f32.mrf.mxu1 }
 0x7a4   :  { %v1202_v6 = vadd.f32 %v1201_v62, %v1124_v2 }
 0x7a5   :  { %v1126_v10 = vpop.f32.mrf.mxu1 }
 0x7a6   :  { %v1211_v12 = vadd.f32 %v1209_v8, %v1202_v6  ;;  %v1204_v13 = vadd.f32 %v1203_v11, %v1126_v10 }
 0x7a7   :  { %v1289_v14 = vpop.f32.mrf.mxu1 }
 0x7a8   :  { %v1213_v16 = vmax.f32 %v1211_v12, 0.0  ;;  %v1212_v17 = vadd.f32 %v1209_v8, %v1204_v13  ;;  %v1290_v0 = vadd.f32 %v1289_v14, %v1219_v7 }
 0x7a9   :  { %v1291_v18 = vpop.f32.mrf.mxu1 }
 0x7aa   :  { %v1214_v19 = vmax.f32 %v1212_v17, 0.0  ;;  %v1292_v20 = vadd.f32 %v1291_v18, %v1219_v7  ;;  %v1294_v21 = vadd.f32 %v1290_v0, %v1213_v16 }
 0x7ac   :  { %v1295_v22 = vadd.f32 %v1292_v20, %v1214_v19 }
 0x7ae   :  { %v1298_v24 = vcombine.low %v1294_v21, %v1295_v22 }
 0x7b0   :  { %v1305_v25 = vrot.slane %v1298_v24, %v1304_v23 }
 0x7b2   :  { %v1312_v26 = vrot.slane %v1305_v25, %v1304_v23 }
 0x7b4   :  { %1318 = vst.msk [vmem:[#allocation7] sm:$0x3] %vm1316_vm12, %v1312_v26 }
 0x7b5   :  { %1446 = shalt.err (!%p1443_p0)
}
 0x7b6   :  { %1328 = dma.vmem_to_hbm [thread:$0]  %s1326_s26, 32, %s1645_s2, [#allocation4]  }
 0x7b7   :  { %1459 = dma.done.wait [#allocation4], 32  }
 0x7b8   :  { %1460 = vsyncadd [#allocation4], 4294967264 }
 0x7b9   :  { %1332 = vsyncpa [#allocation3], 1 }
 0x7ba   :  { %1333 = vsyncpa [#allocation6], 1 }
 0x7bb   :  { %1334 = vsyncpa [#allocation4], 1 }

</bundles_post_ra>
